<compile_context>
chip_gen: v6e
topology: v6e:2x2x1
jax: 0.10.0
libtpu: 0.0.40
codegen_flags: <defaults>
</compile_context>

<pallas_src>
import functools

import jax
import jax.numpy as jnp
from jax.experimental import pallas as pl
from jax.experimental.pallas import tpu as pltpu


# ---------------------------------------------------------------------------
# helpers
# ---------------------------------------------------------------------------
def _round_up(x, m):
    return ((x + m - 1) // m) * m


def _pick_token_tile(T, preferred=256):
    """Token tile: big enough to pipeline, sublane (8) aligned for small T."""
    if T >= preferred:
        return preferred
    return max(8, _round_up(T, 8))


def _pick_i_chunk(I, preferred=512):
    """I-chunk for the expert MLP reduction (128-aligned or full I)."""
    if I >= preferred and I % preferred == 0:
        return preferred
    if I > 256 and I % 256 == 0:
        return 256
    return I


_VMEM_LIMIT = 48 * 1024 * 1024  # fits v7x 64 MiB physical, > v5e 16 MiB default


# ---------------------------------------------------------------------------
# Kernel 1: router logits  (T, H) @ (H, E_pad) -> (T, E_pad)
#   gate weight is pre-transposed and lane-padded in the wrapper (lane-dense
#   output stores, no in-kernel transpose).
# ---------------------------------------------------------------------------
def _router_kernel(x_ref, gate_wt_ref, logits_ref):
    logits_ref[...] = jnp.dot(
        x_ref[...], gate_wt_ref[...], preferred_element_type=jnp.float32
    )


def router_logits_pallas(x, gate_w_t_pad, *, tile_t):
    T_pad, H = x.shape
    E_pad = gate_w_t_pad.shape[1]
    n_t = T_pad // tile_t
    return pl.pallas_call(
        _router_kernel,
        out_shape=jax.ShapeDtypeStruct((T_pad, E_pad), jnp.float32),
        grid_spec=pltpu.PrefetchScalarGridSpec(
            num_scalar_prefetch=0,
            grid=(n_t,),
            in_specs=[
                pl.BlockSpec((tile_t, H), lambda t: (t, 0)),
                pl.BlockSpec((H, E_pad), lambda t: (0, 0)),  # resident
            ],
            out_specs=pl.BlockSpec((tile_t, E_pad), lambda t: (t, 0)),
        ),
        compiler_params=pltpu.CompilerParams(
            dimension_semantics=("parallel",),
            vmem_limit_bytes=_VMEM_LIMIT,
        ),
    )(x, gate_w_t_pad)


# ---------------------------------------------------------------------------
# Kernel 2: MoE expert MLPs.
#   grid = (token tiles [parallel], experts [arbitrary], I-chunks [arbitrary])
#   counts (scalar prefetch, SMEM): per-(token tile, expert) routed-token
#   count; lets us skip the matmuls when no token in the tile uses expert e.
#   x:       (T_pad, H)            resident per token tile
#   w_dense: (T_pad, E)            routing weight per token/expert (0 unused)
#   gate_w:  (E, H, I), up_w: (E, H, I), down_w: (E, I, H)
#   out:     (T_pad, H)            hidden dtype; f32 VMEM scratch accumulator
# ---------------------------------------------------------------------------
def _moe_kernel(counts_ref, x_ref, w_ref, gw_ref, uw_ref, dw_ref, out_ref,
                acc_ref):
    t = pl.program_id(0)
    e = pl.program_id(1)
    i = pl.program_id(2)
    n_e = pl.num_programs(1)
    n_i = pl.num_programs(2)

    @pl.when(jnp.logical_and(e == 0, i == 0))
    def _():
        acc_ref[...] = jnp.zeros_like(acc_ref)

    cnt = counts_ref[t, e]

    @pl.when(cnt > 0)
    def _():
        x = x_ref[...]
        g = jnp.dot(x, gw_ref[0], preferred_element_type=jnp.float32)
        u = jnp.dot(x, uw_ref[0], preferred_element_type=jnp.float32)

        # Per-token routing weight of expert e, extracted from the resident
        # lane-dense (tile_t, E) block via mask + lane reduction.
        lane = jax.lax.broadcasted_iota(jnp.int32, w_ref.shape, 1)
        w_col = jnp.sum(
            jnp.where(lane == e, w_ref[...].astype(jnp.float32), 0.0),
            axis=1, keepdims=True,
        )  # (tile_t, 1)

        # Fold the routing weight into h before the down projection
        # (row scaling commutes with the row-space matmul; I <= H => cheaper).
        h = (g * jax.nn.sigmoid(g)) * u * w_col
        acc_ref[...] += jnp.dot(
            h.astype(x.dtype), dw_ref[0], preferred_element_type=jnp.float32
        )

    @pl.when(jnp.logical_and(e == n_e - 1, i == n_i - 1))
    def _():
        out_ref[...] = acc_ref[...].astype(out_ref.dtype)


def moe_experts_pallas(counts, x, w_dense, gate_w, up_w, down_w, *,
                       tile_t, tile_i, out_dtype):
    T_pad, H = x.shape
    E, _, I = gate_w.shape
    n_t = T_pad // tile_t
    n_i = I // tile_i
    return pl.pallas_call(
        _moe_kernel,
        out_shape=jax.ShapeDtypeStruct((T_pad, H), out_dtype),
        grid_spec=pltpu.PrefetchScalarGridSpec(
            num_scalar_prefetch=1,
            grid=(n_t, E, n_i),
            in_specs=[
                pl.BlockSpec((tile_t, H), lambda t, e, i, cnt: (t, 0)),
                pl.BlockSpec((tile_t, E), lambda t, e, i, cnt: (t, 0)),
                pl.BlockSpec((1, H, tile_i), lambda t, e, i, cnt: (e, 0, i)),
                pl.BlockSpec((1, H, tile_i), lambda t, e, i, cnt: (e, 0, i)),
                pl.BlockSpec((1, tile_i, H), lambda t, e, i, cnt: (e, i, 0)),
            ],
            out_specs=pl.BlockSpec((tile_t, H), lambda t, e, i, cnt: (t, 0)),
            scratch_shapes=[pltpu.VMEM((tile_t, H), jnp.float32)],
        ),
        compiler_params=pltpu.CompilerParams(
            dimension_semantics=("parallel", "arbitrary", "arbitrary"),
            vmem_limit_bytes=_VMEM_LIMIT,
        ),
    )(counts, x, w_dense, gate_w, up_w, down_w)


# ---------------------------------------------------------------------------
# Forward wrapper (glue in plain JAX: softmax / top-k / one-hot / padding)
# ---------------------------------------------------------------------------
@functools.partial(jax.jit, static_argnames=("top_k", "norm_topk_prob"))
def prunable_moe_forward(
    hidden_states, gate_w, expert_gate_w, expert_up_w, expert_down_w,
    *, top_k, norm_topk_prob=False,
):
    B, S, H = hidden_states.shape
    E, _, I = expert_gate_w.shape
    dtype = hidden_states.dtype
    T = B * S
    x = hidden_states.reshape(T, H)

    tile_t = _pick_token_tile(T)
    T_pad = _round_up(T, tile_t)
    if T_pad != T:
        x_p = jnp.zeros((T_pad, H), dtype).at[:T].set(x)
    else:
        x_p = x

    # --- router: pre-transposed, lane-padded gate weight -------------------
    E_pad = _round_up(E, 128)
    gate_w_t = jnp.zeros((H, E_pad), dtype).at[:, :E].set(gate_w.T.astype(dtype))
    logits_pad = router_logits_pallas(x_p, gate_w_t, tile_t=tile_t)
    router_logits = logits_pad[:T, :E].astype(dtype)

    # TODO(synk): experts_to_drop masking (-inf on dropped columns) is
    # host-configured state and is None in this setup.
    routing_weights = jax.nn.softmax(router_logits.astype(jnp.float32), axis=-1)
    k = min(top_k, E)
    topk_w, selected = jax.lax.top_k(routing_weights, k)      # (T, k)
    if norm_topk_prob:
        topk_w = topk_w / jnp.sum(topk_w, axis=-1, keepdims=True)
    topk_w = topk_w.astype(dtype)

    # Dense per-(token, expert) routing weight (0 for unselected experts).
    one_hot = jax.nn.one_hot(selected, E, dtype=topk_w.dtype)  # (T, k, E)
    w_dense = jnp.sum(one_hot * topk_w[..., None], axis=1)     # (T, E)
    if T_pad != T:
        w_dense_p = jnp.zeros((T_pad, E), dtype).at[:T].set(w_dense)
    else:
        w_dense_p = w_dense

    # Per-(token tile, expert) routed-token counts for the skip-on-zero path.
    counts = jnp.sum(
        (w_dense_p.reshape(T_pad // tile_t, tile_t, E) > 0), axis=1
    ).astype(jnp.int32)

    tile_i = _pick_i_chunk(I)
    final_p = moe_experts_pallas(
        counts, x_p, w_dense_p,
        expert_gate_w.astype(dtype),
        expert_up_w.astype(dtype),
        expert_down_w.astype(dtype),
        tile_t=tile_t, tile_i=tile_i, out_dtype=dtype,
    )
    final = final_p[:T]
    return final.reshape(B, S, H), router_logits


# ---------------------------------------------------------------------------
# Pure-JAX reference (correctness check; same math order as the torch module)
# ---------------------------------------------------------------------------
def reference_forward(hidden_states, gate_w, gw, uw, dw, *, top_k,
                      norm_topk_prob=False):
    B, S, H = hidden_states.shape
    E = gate_w.shape[0]
    x = hidden_states.reshape(-1, H)
    logits = (x @ gate_w.T).astype(jnp.float32).astype(x.dtype)
    rw = jax.nn.softmax(logits.astype(jnp.float32), axis=-1)
    k = min(top_k, E)
    tw, sel = jax.lax.top_k(rw, k)
    if norm_topk_prob:
        tw = tw / jnp.sum(tw, axis=-1, keepdims=True)
    tw = tw.astype(x.dtype)
    w_dense = jnp.sum(jax.nn.one_hot(sel, E, dtype=tw.dtype) * tw[..., None], 1)
    out = jnp.zeros_like(x)
    for e in range(E):
        g = x @ gw[e]
        u = x @ uw[e]
        h = (g * jax.nn.sigmoid(g)) * u
        out = out + (h @ dw[e]) * w_dense[:, e:e + 1]
    return out.reshape(B, S, H), logits


if __name__ == "__main__":
    # Small OLMoE-like config
    B, S, H = 2, 8, 32       # batch, seq, hidden_dim
    E, I = 8, 64             # num_experts, intermediate size
    TOP_K = 2
    NORM_TOPK = False        # OLMoE default norm_topk_prob=False

    key = jax.random.PRNGKey(0)
    k0, k1, k2, k3, k4 = jax.random.split(key, 5)
    hidden_states = jax.random.normal(k0, (B, S, H), dtype=jnp.float32)
    gate_w = 0.05 * jax.random.normal(k1, (E, H), dtype=jnp.float32)
    expert_gate_w = 0.05 * jax.random.normal(k2, (E, H, I), dtype=jnp.float32)
    expert_up_w = 0.05 * jax.random.normal(k3, (E, H, I), dtype=jnp.float32)
    expert_down_w = 0.05 * jax.random.normal(k4, (E, I, H), dtype=jnp.float32)

    final, logits = prunable_moe_forward(
        hidden_states, gate_w, expert_gate_w, expert_up_w, expert_down_w,
        top_k=TOP_K, norm_topk_prob=NORM_TOPK,
    )
    jax.block_until_ready((final, logits))

    ref_final, ref_logits = reference_forward(
        hidden_states, gate_w, expert_gate_w, expert_up_w, expert_down_w,
        top_k=TOP_K, norm_topk_prob=NORM_TOPK,
    )
    assert final.shape == (B, S, H)
    assert logits.shape == (B * S, E)
    assert jnp.allclose(logits, ref_logits, atol=1e-5, rtol=1e-5), (
        jnp.max(jnp.abs(logits - ref_logits)))
    assert jnp.allclose(final, ref_final, atol=1e-4, rtol=1e-4), (
        jnp.max(jnp.abs(final - ref_final)))

    print("KERNEL_OK")
</pallas_src>

<mosaic_0001>
module attributes {stable_mosaic.version = 11 : i64} {
  func.func @_router_kernel(%arg0: i32, %arg1: memref<16x32xf32, #tpu.memory_space<vmem>>, %arg2: memref<32x128xf32, #tpu.memory_space<vmem>>, %arg3: memref<16x128xf32, #tpu.memory_space<vmem>>) attributes {dimension_semantics = [#tpu.dimension_semantics<parallel>], iteration_bounds = array<i64: 1>, scalar_prefetch = 0 : i64, scratch_operands = 0 : i64, tpu.core_type = #tpu.core_type<tc>, window_params = [{transform_indices = @transform_0, window_bounds = array<i64: 16, 32>}, {pipeline_mode = #tpu.pipeline_mode<synchronous>, transform_indices = @transform_1, window_bounds = array<i64: 32, 128>}, {transform_indices = @transform_2, window_bounds = array<i64: 16, 128>}]} {
    %c0 = arith.constant 0 : index
    %c0_0 = arith.constant 0 : index
    %0 = vector.load %arg1[%c0, %c0_0] : memref<16x32xf32, #tpu.memory_space<vmem>>, vector<16x32xf32>
    %c0_1 = arith.constant 0 : index
    %c0_2 = arith.constant 0 : index
    %1 = vector.load %arg2[%c0_1, %c0_2] : memref<32x128xf32, #tpu.memory_space<vmem>>, vector<32x128xf32>
    %cst = arith.constant dense<0.000000e+00> : vector<16x128xf32>
    %2 = tpu.matmul %0, %1, %cst {dimension_numbers = #tpu.dot_dimension_numbers<[1], [0], [0], [1], [0, 0, 1, 1], [], []>} : vector<16x32xf32>, vector<32x128xf32>, vector<16x128xf32> -> vector<16x128xf32>
    %c0_3 = arith.constant 0 : index
    %c0_4 = arith.constant 0 : index
    %3 = vector.load %arg3[%c0_3, %c0_4] : memref<16x128xf32, #tpu.memory_space<vmem>>, vector<16x128xf32>
    tpu.vector_store %arg3[%c0_3, %c0_4], %2 {strides = array<i32>} : memref<16x128xf32, #tpu.memory_space<vmem>>, vector<16x128xf32>,
    return
  }
  func.func @transform_0(%arg0: i32) -> (i32, i32) {
    %c0_i32 = arith.constant 0 : i32
    %c0_i32_0 = arith.constant 0 : i32
    return %arg0, %c0_i32 : i32, i32
  }
  func.func @transform_1(%arg0: i32) -> (i32, i32) {
    %c0_i32 = arith.constant 0 : i32
    %c0_i32_0 = arith.constant 0 : i32
    %c0_i32_1 = arith.constant 0 : i32
    return %c0_i32, %c0_i32_0 : i32, i32
  }
  func.func @transform_2(%arg0: i32) -> (i32, i32) {
    %c0_i32 = arith.constant 0 : i32
    %c0_i32_0 = arith.constant 0 : i32
    return %arg0, %c0_i32 : i32, i32
  }
}

module attributes {stable_mosaic.version = 11 : i64} {
  func.func @_moe_kernel(%arg0: i32, %arg1: i32, %arg2: i32, %arg3: memref<1x8xi32, #tpu.memory_space<smem>>, %arg4: memref<16x32xf32, #tpu.memory_space<vmem>>, %arg5: memref<16x8xf32, #tpu.memory_space<vmem>>, %arg6: memref<1x32x64xf32, #tpu.memory_space<vmem>>, %arg7: memref<1x32x64xf32, #tpu.memory_space<vmem>>, %arg8: memref<1x64x32xf32, #tpu.memory_space<vmem>>, %arg9: memref<16x32xf32, #tpu.memory_space<vmem>>, %arg10: memref<16x32xf32, #tpu.memory_space<vmem>>) attributes {dimension_semantics = [#tpu.dimension_semantics<parallel>, #tpu.dimension_semantics<arbitrary>, #tpu.dimension_semantics<arbitrary>], iteration_bounds = array<i64: 1, 8, 1>, scalar_prefetch = 1 : i64, scratch_operands = 1 : i64, tpu.core_type = #tpu.core_type<tc>, window_params = [{transform_indices = @transform_0, window_bounds = array<i64: 16, 32>}, {transform_indices = @transform_1, window_bounds = array<i64: 16, 8>}, {transform_indices = @transform_2, window_bounds = array<i64: 1, 32, 64>}, {transform_indices = @transform_3, window_bounds = array<i64: 1, 32, 64>}, {transform_indices = @transform_4, window_bounds = array<i64: 1, 64, 32>}, {transform_indices = @transform_5, window_bounds = array<i64: 16, 32>}]} {
    %c0_i32 = arith.constant 0 : i32
    %0 = arith.cmpi eq, %arg1, %c0_i32 : i32
    %c0_i32_0 = arith.constant 0 : i32
    %1 = arith.cmpi eq, %arg2, %c0_i32_0 : i32
    %2 = arith.andi %0, %1 : i1
    %3 = arith.extui %2 : i1 to i32
    %c0_i32_1 = arith.constant 0 : i32
    %4 = arith.cmpi ne, %3, %c0_i32_1 : i32
    scf.if %4 {
      %cst = arith.constant 0.000000e+00 : f32
      %16 = vector.broadcast %cst : f32 to vector<16x32xf32>
      %c0 = arith.constant 0 : index
      %c0_6 = arith.constant 0 : index
      %17 = vector.load %arg10[%c0, %c0_6] : memref<16x32xf32, #tpu.memory_space<vmem>>, vector<16x32xf32>
      tpu.vector_store %arg10[%c0, %c0_6], %16 {strides = array<i32>} : memref<16x32xf32, #tpu.memory_space<vmem>>, vector<16x32xf32>,
    } else {
    }
    %5 = arith.index_cast %arg0 : i32 to index
    %6 = arith.index_cast %arg1 : i32 to index
    %7 = memref.load %arg3[%5, %6] : memref<1x8xi32, #tpu.memory_space<smem>>
    %c0_i32_2 = arith.constant 0 : i32
    %8 = arith.cmpi sgt, %7, %c0_i32_2 : i32
    %9 = arith.extui %8 : i1 to i32
    %c0_i32_3 = arith.constant 0 : i32
    %10 = arith.cmpi ne, %9, %c0_i32_3 : i32
    scf.if %10 {
      %c0 = arith.constant 0 : index
      %c0_6 = arith.constant 0 : index
      %16 = vector.load %arg4[%c0, %c0_6] : memref<16x32xf32, #tpu.memory_space<vmem>>, vector<16x32xf32>
      %c0_7 = arith.constant 0 : index
      %c0_8 = arith.constant 0 : index
      %c0_9 = arith.constant 0 : index
      %17 = vector.load %arg6[%c0_7, %c0_8, %c0_9] : memref<1x32x64xf32, #tpu.memory_space<vmem>>, vector<1x32x64xf32>
      %18 = vector.shape_cast %17 : vector<1x32x64xf32> to vector<32x64xf32>
      %cst = arith.constant dense<0.000000e+00> : vector<16x64xf32>
      %19 = tpu.matmul %16, %18, %cst {dimension_numbers = #tpu.dot_dimension_numbers<[1], [0], [0], [1], [0, 0, 1, 1], [], []>} : vector<16x32xf32>, vector<32x64xf32>, vector<16x64xf32> -> vector<16x64xf32>
      %c0_10 = arith.constant 0 : index
      %c0_11 = arith.constant 0 : index
      %c0_12 = arith.constant 0 : index
      %20 = vector.load %arg7[%c0_10, %c0_11, %c0_12] : memref<1x32x64xf32, #tpu.memory_space<vmem>>, vector<1x32x64xf32>
      %21 = vector.shape_cast %20 : vector<1x32x64xf32> to vector<32x64xf32>
      %cst_13 = arith.constant dense<0.000000e+00> : vector<16x64xf32>
      %22 = tpu.matmul %16, %21, %cst_13 {dimension_numbers = #tpu.dot_dimension_numbers<[1], [0], [0], [1], [0, 0, 1, 1], [], []>} : vector<16x32xf32>, vector<32x64xf32>, vector<16x64xf32> -> vector<16x64xf32>
      %23 = tpu.iota {dimensions = array<i32: 1>} : vector<16x8xi32>
      %24 = vector.broadcast %arg1 : i32 to vector<16x8xi32>
      %25 = arith.cmpi eq, %23, %24 : vector<16x8xi32>
      %c0_14 = arith.constant 0 : index
      %c0_15 = arith.constant 0 : index
      %26 = vector.load %arg5[%c0_14, %c0_15] : memref<16x8xf32, #tpu.memory_space<vmem>>, vector<16x8xf32>
      %cst_16 = arith.constant 0.000000e+00 : f32
      %27 = vector.broadcast %cst_16 : f32 to vector<16x8xf32>
      %28 = arith.select %25, %26, %27 : vector<16x8xi1>, vector<16x8xf32>
      %cst_17 = arith.constant dense<0.000000e+00> : vector<16xf32>
      %29 = vector.multi_reduction <add>, %28, %cst_17 [1] : vector<16x8xf32> to vector<16xf32>
      %30 = vector.shape_cast %29 : vector<16xf32> to vector<16x1xf32>
      %31 = arith.negf %19 : vector<16x64xf32>
      %32 = math.exp %31 : vector<16x64xf32>
      %cst_18 = arith.constant 1.000000e+00 : f32
      %33 = vector.broadcast %cst_18 : f32 to vector<16x64xf32>
      %34 = arith.addf %33, %32 : vector<16x64xf32>
      %35 = arith.divf %33, %34 : vector<16x64xf32>
      %36 = arith.mulf %19, %35 : vector<16x64xf32>
      %37 = arith.mulf %36, %22 : vector<16x64xf32>
      %38 = vector.broadcast %30 : vector<16x1xf32> to vector<16x64xf32>
      %39 = arith.mulf %37, %38 : vector<16x64xf32>
      %c0_19 = arith.constant 0 : index
      %c0_20 = arith.constant 0 : index
      %40 = vector.load %arg10[%c0_19, %c0_20] : memref<16x32xf32, #tpu.memory_space<vmem>>, vector<16x32xf32>
      %c0_21 = arith.constant 0 : index
      %c0_22 = arith.constant 0 : index
      %c0_23 = arith.constant 0 : index
      %41 = vector.load %arg8[%c0_21, %c0_22, %c0_23] : memref<1x64x32xf32, #tpu.memory_space<vmem>>, vector<1x64x32xf32>
      %42 = vector.shape_cast %41 : vector<1x64x32xf32> to vector<64x32xf32>
      %cst_24 = arith.constant dense<0.000000e+00> : vector<16x32xf32>
      %43 = tpu.matmul %39, %42, %cst_24 {dimension_numbers = #tpu.dot_dimension_numbers<[1], [0], [0], [1], [0, 0, 1, 1], [], []>} : vector<16x64xf32>, vector<64x32xf32>, vector<16x32xf32> -> vector<16x32xf32>
      %44 = arith.addf %40, %43 : vector<16x32xf32>
      %c0_25 = arith.constant 0 : index
      %c0_26 = arith.constant 0 : index
      %45 = vector.load %arg10[%c0_25, %c0_26] : memref<16x32xf32, #tpu.memory_space<vmem>>, vector<16x32xf32>
      tpu.vector_store %arg10[%c0_25, %c0_26], %44 {strides = array<i32>} : memref<16x32xf32, #tpu.memory_space<vmem>>, vector<16x32xf32>,
    } else {
    }
    %c7_i32 = arith.constant 7 : i32
    %11 = arith.cmpi eq, %arg1, %c7_i32 : i32
    %c0_i32_4 = arith.constant 0 : i32
    %12 = arith.cmpi eq, %arg2, %c0_i32_4 : i32
    %13 = arith.andi %11, %12 : i1
    %14 = arith.extui %13 : i1 to i32
    %c0_i32_5 = arith.constant 0 : i32
    %15 = arith.cmpi ne, %14, %c0_i32_5 : i32
    scf.if %15 {
      %c0 = arith.constant 0 : index
      %c0_6 = arith.constant 0 : index
      %16 = vector.load %arg10[%c0, %c0_6] : memref<16x32xf32, #tpu.memory_space<vmem>>, vector<16x32xf32>
      %c0_7 = arith.constant 0 : index
      %c0_8 = arith.constant 0 : index
      %17 = vector.load %arg9[%c0_7, %c0_8] : memref<16x32xf32, #tpu.memory_space<vmem>>, vector<16x32xf32>
      tpu.vector_store %arg9[%c0_7, %c0_8], %16 {strides = array<i32>} : memref<16x32xf32, #tpu.memory_space<vmem>>, vector<16x32xf32>,
    } else {
    }
    return
  }
  func.func @transform_0(%arg0: i32, %arg1: i32, %arg2: i32, %arg3: memref<1x8xi32, #tpu.memory_space<smem>>) -> (i32, i32) {
    %c0_i32 = arith.constant 0 : i32
    %c0_i32_0 = arith.constant 0 : i32
    return %arg0, %c0_i32 : i32, i32
  }
  func.func @transform_1(%arg0: i32, %arg1: i32, %arg2: i32, %arg3: memref<1x8xi32, #tpu.memory_space<smem>>) -> (i32, i32) {
    %c0_i32 = arith.constant 0 : i32
    %c0_i32_0 = arith.constant 0 : i32
    return %arg0, %c0_i32 : i32, i32
  }
  func.func @transform_2(%arg0: i32, %arg1: i32, %arg2: i32, %arg3: memref<1x8xi32, #tpu.memory_space<smem>>) -> (i32, i32, i32) {
    %c0_i32 = arith.constant 0 : i32
    %c0_i32_0 = arith.constant 0 : i32
    return %arg1, %c0_i32, %arg2 : i32, i32, i32
  }
  func.func @transform_3(%arg0: i32, %arg1: i32, %arg2: i32, %arg3: memref<1x8xi32, #tpu.memory_space<smem>>) -> (i32, i32, i32) {
    %c0_i32 = arith.constant 0 : i32
    %c0_i32_0 = arith.constant 0 : i32
    return %arg1, %c0_i32, %arg2 : i32, i32, i32
  }
  func.func @transform_4(%arg0: i32, %arg1: i32, %arg2: i32, %arg3: memref<1x8xi32, #tpu.memory_space<smem>>) -> (i32, i32, i32) {
    %c0_i32 = arith.constant 0 : i32
    %c0_i32_0 = arith.constant 0 : i32
    return %arg1, %arg2, %c0_i32 : i32, i32, i32
  }
  func.func @transform_5(%arg0: i32, %arg1: i32, %arg2: i32, %arg3: memref<1x8xi32, #tpu.memory_space<smem>>) -> (i32, i32) {
    %c0_i32 = arith.constant 0 : i32
    %c0_i32_0 = arith.constant 0 : i32
    return %arg0, %c0_i32 : i32, i32
  }
}

</mosaic_0001>

<bundles_post_ra>
// kernel: prunable_moe_forward.2
= control target key start
LH: loop header
LB: loop body
LE: loop exit
PB: predicated region body
PF: predicated region fallthrough
CT: control target
= control target key end

     0   :  { %7 = vsyncpa [#allocation3], 0  ;;  %s164_s9 = smov [#allocation2]   ;;  %s205_s0 = inlined_call_operand.hbm [shape: f32[16,32], index: 0, kind: input, shape index: {}]   ;;  %s206_s1 = inlined_call_operand.vmem [shape: f32[32,128], index: 1, kind: input, shape index: {}]   ;;  %s207_s2 = inlined_call_operand.vmem [shape: f32[16,128], index: 2, kind: output, shape index: {}]  }
   0x1   :  { %s13_s10 = sshll.u32 %s164_s9, 4  ;;  %s14_s10 = int_to_ptr.vmem [resolvable:$true] %s13_s10 }
   0x2   :  { %s150_s11 = scalar_lea.vmem %s14_s10, 256  ;;  %p155_p1 = scmp.lt.s32.totalorder %s14_s10, %s14_s10 }
   0x3   :  { %p151_p0 = scmp.ne.s32.totalorder %s14_s10, %s150_s11  ;;  %p156_p2 = scmp.lt.s32.totalorder %s150_s11, %s150_s11 }
   0x5   :  { %p157_p3 = por %p156_p2, %p155_p1 }
   0x7   :  { %p158_p4 = pnand %p157_p3, %p151_p0 }
   0x9   :  { %161 = shalt.err (!%p158_p4)
}
   0xa   :  { %s165_s12 = smov 128   ;;  %s166_s13 = smov 8  }
   0xb   :  { %19 = dma.hbm_to_vmem [thread:$0]  %s205_s0, 256, %s14_s10, [#allocation3], %s165_s12, %s165_s12, %s166_s13  }
   0xc   :  { %162 = dma.done.wait [#allocation3], 256  }
   0xd   :  { %163 = vsyncadd [#allocation3], 4294967040  ;;  %vm31_vm0 = vcmask 261120   ;;  %v30_v0 = vld [vmem:[%s206_s1 + $0x18] sm:$0xff]  ;;  %v29_v1 = vld [vmem:[%s206_s1 + $0x10] sm:$0xff] }
   0xe   :  { %128 = vmatprep.subr.mxu0 %v30_v0  ;;  %v25_v2 = vld [vmem:[#allocation2] sm:$0xff]  ;;  %v28_v3 = vld [vmem:[%s206_s1 + $0x8] sm:$0xff] }
   0xf   :  { %129 = vmatpush3.msra.mxu0 %v30_v0  ;;  %136 = vmatprep.mubr.msk.f32.mxu0 %vm31_vm0, %v25_v2  ;;  %v27_v4 = vld [vmem:[%s206_s1] sm:$0xff]  ;;  %v26_v5 = vld [vmem:[#allocation2 + $0x8] sm:$0xff] }
  0x10   :  { %130 = vmatprep.subr.mxu0 %v29_v1 }
  0x11   :  { %131 = vmatpush3.msra.mxu0 %v29_v1 }
  0x12   :  { %132 = vmatprep.subr.mxu0 %v28_v3 }
  0x13   :  { %133 = vmatpush3.msra.mxu0 %v28_v3 }
  0x14   :  { %134 = vmatprep.subr.mxu0 %v27_v4 }
  0x15   :  { %135 = vmatpush3.msra.mxu0 %v27_v4 }
  0x16   :  { %137 = vmatmul.mubr.msk.f32.vlgmr.msra.gmra.mxu0 %vm31_vm0, %v26_v5 }
  0xd6   :  { %v138_v6 = vpop.f32.mrf.mxu0 }
  0xd7   :  { %114 = vst [vmem:[%s207_s2 + $0x8] sm:$0xff] %v138_v6 }
  0xd8   :  { %v104_v7 = vpop.f32.mrf.mxu0 }
  0xd9   :  { %113 = vst [vmem:[%s207_s2] sm:$0xff] %v104_v7 }
  0xda   :  { %119 = vsyncpa [#allocation3], 1 }

// kernel: prunable_moe_forward.3
= control target key start
LH: loop header
LB: loop body
LE: loop exit
PB: predicated region body
PF: predicated region fallthrough
CT: control target
= control target key end

     0   :  { %s1182_s0 = inlined_call_operand.vmem [shape: s32[1,8], index: 0, kind: input, shape index: {}]   ;;  %s1183_s1 = inlined_call_operand.vmem [shape: f32[16,32], index: 1, kind: input, shape index: {}]   ;;  %s1184_s2 = inlined_call_operand.vmem [shape: f32[16,8], index: 2, kind: input, shape index: {}]   ;;  %s1185_s3 = inlined_call_operand.vmem [shape: f32[8,32,64], index: 3, kind: input, shape index: {}]   ;;  %s1186_s4 = inlined_call_operand.vmem [shape: f32[8,32,64], index: 4, kind: input, shape index: {}]   ;;  %s1187_s5 = inlined_call_operand.vmem [shape: f32[8,64,32], index: 5, kind: input, shape index: {}]   ;;  %s1188_s6 = inlined_call_operand.hbm [shape: f32[16,32], index: 6, kind: output, shape index: {}]  }
   0x1   :  { %s11_s23 = sshll.u32 %s1182_s0, 4  ;;  %s12_s23 = int_to_ptr.vmem [resolvable:$true] %s11_s23 }
   0x2   :  { %s968_s24 = scalar_lea.vmem %s12_s23, 16  ;;  %p973_p1 = scmp.lt.s32.totalorder %s12_s23, %s12_s23 }
   0x3   :  { %p969_p0 = scmp.ne.s32.totalorder %s12_s23, %s968_s24  ;;  %p974_p2 = scmp.lt.s32.totalorder %s968_s24, %s968_s24 }
   0x5   :  { %p975_p3 = por %p974_p2, %p973_p1 }
   0x7   :  { %p976_p4 = pnand %p975_p3, %p969_p0 }
   0x9   :  { %979 = shalt.err (!%p976_p4)  }
   0xa   :  { %s1034_s25 = smov [#allocation4]  }
   0xb   :  { %14 = dma.vmem_to_smem %s12_s23, 16, %s1034_s25, [#allocation3] }
   0xc   :  { %1016 = dma.done.wait [#allocation3], 16 }
   0xd   :  { %1017 = vsyncadd [#allocation3], 4294967280 }
   0xe   :  { %16 = sfence }
   0xf   :  { %17 = vsyncpa [#allocation6], 0  ;;  %s1077_s26 = smov 0   ;;  %s1079_s27 = smov 0  }
  0x10   :  { %s1081_s28 = smov 0  }
  0x11 LB: > { %s829_s0 = sadd.s32 4294967295, %s1032_s28   ;;  %s38_s29 = sadd.s32 1, %s1028_s27  ;;  %s1032_s28 = sphi %s1081_s28, %s23_s28   ;;  %s1028_s27 = sphi %s1079_s27, %s1191_s27   ;;  %s1024_s26 = sphi %s1077_s26, %s1190_s26  }
  0x12   : > { %p40_p5 = scmp.ge.s32.totalorder %s38_s29, 8  ;;  %p834_p6 = scmp.ge.s32.totalorder %s1032_s28, 1 }
  0x13   : > { %p273_p7 = scmp.lt.s32.totalorder %s1032_s28, 9 }
  0x14   : > { %s1193_s29 = smov (%p40_p5, %s38_s29), 0 }
  0x15   : > { %p274_p8 = pnand %p834_p6, %p273_p7 }
  0x16   : > { %p338_p9 = scmp.lt.s32.totalorder (!%p274_p8), %s1024_s26, 7  ;;  %p365_p10 = scmp.eq.s32.totalorder (!%p274_p8), %s1024_s26, 0 }
  0x17   : > { %277 = sbr.rel (%p274_p8) target bundleno = 515 (0x203), region = 40 }
  0x1c   : > { %s339_s30 = scalar_select %p338_p9, %s1024_s26, 7  ;;  %vm371_vm0 = vcmask (%p365_p10), 261120   ;;  %v1035_v0 = vmov (%p365_p10), 0.0  }
  0x1d   : > { %370 = sbr.rel (!%p365_p10) target bundleno = 34 (0x22), region = 44  ;;  %372 = vst.msk [vmem:[#allocation2] sm:$0xff] (%p365_p10), %vm371_vm0, %v1035_v0  ;;  %373 = vst.msk [vmem:[#allocation2 + $0x8] sm:$0xff] (%p365_p10), %vm371_vm0, %v1035_v0 }
  0x1e   : > { %s857_s7 = sshll.u32 %s339_s30, 5  ;;  %s859_s8 = sshll.u32 %s339_s30, 6 }
  0x1f   : > { %s1104_s11 = scalar_lea.vmem %s1185_s3, %s857_s7  ;;  %s1109_s14 = scalar_lea.vmem %s1186_s4, %s857_s7 }
  0x20   : > { %s1114_s17 = scalar_lea.vmem %s1187_s5, %s859_s8 }
  0x22 PF: > { %s374_s18 = sshra.s32 %s1024_s26, 7  ;;  %s379_s19 = sand.u32 127, %s1024_s26 }
  0x23   : > { %s842_s20 = sshll.u32 %s374_s18, 7 }
  0x24   : > { %s380_s21 = sadd.s32 %s842_s20, %s379_s19 }
  0x25   : > { %s381_s22 = sld [smem:[#allocation4 + %s380_s21]] }
  0x2b   : > { %p843_p11 = scmp.le.s32.totalorder %s381_s22, 0 }
  0x2d   : > { %385 = sbr.rel (%p843_p11) target bundleno = 491 (0x1eb), region = 48 }
  0x32   : > { %v391_v1 = vld [vmem:[%s1104_s11 + $0x18] sm:$0xff]  ;;  %v390_v2 = vld [vmem:[%s1104_s11 + $0x10] sm:$0xff]  ;;  %vm392_vm1 = vcmask 261120   ;;  %v553_v3 = vlaneseq  ;;  %v386_v4 = vld [vmem:[%s1183_s1] sm:$0xff]  ;;  %v555_v5 = vstv %s1024_s26  ;;  %vm561_vm2 = vcmask 64512  }
  0x33   : > { %884 = vmatprep.subr.mxu1 %v391_v1  ;;  %v389_v6 = vld [vmem:[%s1104_s11 + $0x8] sm:$0xff]  ;;  %892 = vmatprep.mubr.msk.f32.mxu1 %vm392_vm1, %v386_v4  ;;  %v557_v8 = vld [vmem:[%s1184_s2] sm:$0xff]  ;;  %v477_v14 = vld [vmem:[%s1109_s14 + $0x18] sm:$0xff]  ;;  %vm596_vm4 = vcmask 523264  }
  0x34   : > { %885 = vmatpush3.msra.mxu1 %v391_v1  ;;  %v554_v7 = vand.u32 127, %v553_v3  ;;  %v558_v9 = vld [vmem:[%s1184_s2 + $0x8] sm:$0xff]  ;;  %v388_v10 = vld [vmem:[%s1104_s11] sm:$0xff]  ;;  %v476_v16 = vld [vmem:[%s1109_s14 + $0x10] sm:$0xff] }
  0x35   : > { %886 = vmatprep.subr.mxu1 %v390_v2  ;;  %v387_v13 = vld [vmem:[%s1183_s1 + $0x8] sm:$0xff]  ;;  %v474_v19 = vld [vmem:[%s1109_s14] sm:$0xff]  ;;  %v595_v20 = vld [vmem:[%s1114_s17 + $0x38] sm:$0xff] }
  0x36   : > { %887 = vmatpush3.msra.mxu1 %v390_v2  ;;  %vm556_vm3 = vcmp.eq.s32.totalorder %v554_v7, %v555_v5  ;;  %v475_v18 = vld [vmem:[%s1109_s14 + $0x8] sm:$0xff]  ;;  %906 = vmatprep.subr.mxu0 %v595_v20  ;;  %v594_v21 = vld [vmem:[%s1114_s17 + $0x30] sm:$0xff]  ;;  %v592_v23 = vld [vmem:[%s1114_s17 + $0x20] sm:$0xff] }
  0x37   : > { %888 = vmatprep.subr.mxu1 %v389_v6  ;;  %v559_v11 = vsel %vm556_vm3, %v557_v8, 0.0  ;;  %v560_v12 = vsel %vm556_vm3, %v558_v9, 0.0  ;;  %907 = vmatpush3.msra.mxu0 %v595_v20  ;;  %v593_v22 = vld [vmem:[%s1114_s17 + $0x28] sm:$0xff]  ;;  %v591_v24 = vld [vmem:[%s1114_s17 + $0x18] sm:$0xff]  ;;  %v590_v25 = vld [vmem:[%s1114_s17 + $0x10] sm:$0xff] }
  0x38   : > { %889 = vmatpush3.msra.mxu1 %v389_v6  ;;  %v562_v15 = vsel %vm561_vm2, %v559_v11, 0.0  ;;  %v565_v17 = vsel %vm561_vm2, %v560_v12, 0.0  ;;  %908 = vmatprep.subr.mxu0 %v594_v21  ;;  %v589_v26 = vld [vmem:[%s1114_s17 + $0x8] sm:$0xff]  ;;  %v588_v27 = vld [vmem:[%s1114_s17] sm:$0xff] }
  0x39   : > { %890 = vmatprep.subr.mxu1 %v388_v10  ;;  %563 = vadd.xlane.f32.xlu0 %v562_v15  ;;  %v587_v48 = vld [vmem:[#allocation2 + $0x8] sm:$0xff]  ;;  %v586_v50 = vld [vmem:[#allocation2] sm:$0xff] }
  0x3a   : > { %891 = vmatpush3.msra.mxu1 %v388_v10  ;;  %909 = vmatpush3.msra.mxu0 %v594_v21 }
  0x3b   : > { %893 = vmatmul.mubr.msk.f32.vlgmr.msra.gmra.mxu1 %vm392_vm1, %v387_v13  ;;  %895 = vmatprep.subr.mxu1 %v477_v14 }
  0x3c   : > { %896 = vmatpush3.msra.mxu1 %v477_v14  ;;  %903 = vmatprep.mubr.msk.f32.mxu1 %vm392_vm1, %v386_v4 }
  0x3d   : > { %897 = vmatprep.subr.mxu1 %v476_v16  ;;  %566 = vadd.xlane.f32.xlu0 %v565_v17 }
  0x3e   : > { %898 = vmatpush3.msra.mxu1 %v476_v16  ;;  %910 = vmatprep.subr.mxu0 %v593_v22 }
  0x3f   : > { %899 = vmatprep.subr.mxu1 %v475_v18  ;;  %911 = vmatpush3.msra.mxu0 %v593_v22 }
  0x40   : > { %900 = vmatpush3.msra.mxu1 %v475_v18  ;;  %912 = vmatprep.subr.mxu0 %v592_v23 }
  0x41   : > { %901 = vmatprep.subr.mxu1 %v474_v19  ;;  %913 = vmatpush3.msra.mxu0 %v592_v23 }
  0x42   : > { %902 = vmatpush3.msra.mxu1 %v474_v19  ;;  %914 = vmatprep.subr.mxu0 %v591_v24 }
  0x43   : > { %904 = vmatmul.mubr.msk.f32.vlgmr.msra.gmra.mxu1 %vm392_vm1, %v387_v13  ;;  %915 = vmatpush3.msra.mxu0 %v591_v24 }
  0x44   : > { %916 = vmatprep.subr.mxu0 %v590_v25 }
  0x45   : > { %917 = vmatpush3.msra.mxu0 %v590_v25 }
  0x46   : > { %918 = vmatprep.subr.mxu0 %v589_v26 }
  0x47   : > { %919 = vmatpush3.msra.mxu0 %v589_v26 }
  0x48   : > { %920 = vmatprep.subr.mxu0 %v588_v27 }
  0x49   : > { %921 = vmatpush3.msra.mxu0 %v588_v27 }
  0xc2   : > { %v564_v36 = vpop.xlane.xlu0 %563 }
  0xc6   : > { %v567_v45 = vpop.xlane.xlu0 %566 }
  0xfb   : > { %v894_v28 = vpop.f32.mrf.mxu1 }
  0xfc   : > { %v849_v29 = vmul.f32 -1.442695, %v894_v28 }
  0xfd   : > { %v465_v30 = vpop.f32.mrf.mxu1 }
  0xfe   : > { %960 = vpow2.f32 %v849_v29  ;;  %v848_v31 = vmul.f32 -1.442695, %v465_v30 }
 0x100   : > { %962 = vpow2.f32 %v848_v31 }
 0x103   : > { %v905_v38 = vpop.f32.mrf.mxu1 }
 0x105   : > { %v544_v43 = vpop.f32.mrf.mxu1 }
 0x10b   : > { %v961_v32 = vpop.eup %960 }
 0x10c   : > { %v575_v33 = vadd.f32 1.0, %v961_v32 }
 0x10d   : > { %v963_v34 = vpop.eup %962 }
 0x10e   : > { %964 = vrcp.f32 %v575_v33  ;;  %v574_v35 = vadd.f32 1.0, %v963_v34 }
 0x110   : > { %966 = vrcp.f32 %v574_v35 }
 0x11b   : > { %v965_v37 = vpop.eup %964 }
 0x11c   : > { %v581_v39 = vmul.f32 %v965_v37, %v894_v28 }
 0x11d   : > { %v967_v40 = vpop.eup %966 }
 0x11e   : > { %v580_v41 = vmul.f32 %v967_v40, %v465_v30  ;;  %v583_v42 = vmul.f32 %v905_v38, %v581_v39 }
 0x120   : > { %v582_v44 = vmul.f32 %v580_v41, %v544_v43  ;;  %v585_v47 = vmul.f32 %v583_v42, %v567_v45 }
 0x122   : > { %v584_v46 = vmul.f32 %v582_v44, %v564_v36 }
 0x124   : > { %922 = vmatprep.mubr.msk.f32.mxu0 %vm596_vm4, %v584_v46 }
 0x125   : > { %923 = vmatmul.mubr.msk.f32.vlgmr.msra.gmra.mxu0 %vm596_vm4, %v585_v47 }
 0x1e5   : > { %v924_v49 = vpop.f32.mrf.mxu0 }
 0x1e6   : > { %v679_v51 = vadd.f32 %v924_v49, %v587_v48 }
 0x1e7   : > { %v669_v52 = vpop.f32.mrf.mxu0 }
 0x1e8   : > { %681 = vst.msk [vmem:[#allocation2 + $0x8] sm:$0xff] %vm392_vm1, %v679_v51  ;;  %v678_v53 = vadd.f32 %v669_v52, %v586_v50 }
 0x1ea   : > { %680 = vst.msk [vmem:[#allocation2] sm:$0xff] %vm392_vm1, %v678_v53 }
 0x1eb PF: > { %p682_p12 = scmp.eq.s32.totalorder %s1024_s26, 7 }
 0x1ec   : > { %vm689_vm5 = vcmask (%p682_p12), 261120  }
 0x1ed   : > { %686 = sbr.rel (!%p682_p12) target bundleno = 499 (0x1f3), region = 52 }
 0x1ef   : > { %v688_v55 = vld [vmem:[#allocation2 + $0x8] sm:$0xff] (%p682_p12) }
 0x1f0   : > { %691 = vst.msk [vmem:[#allocation5 + $0x8] sm:$0xff] (%p682_p12), %vm689_vm5, %v688_v55 }
 0x1f1   : > { %v687_v54 = vld [vmem:[#allocation2] sm:$0xff] (%p682_p12) }
 0x1f2   : > { %690 = vst.msk [vmem:[#allocation5] sm:$0xff] %vm689_vm5, %v687_v54 }
 0x1f3 PF: > { %p1158_p13 = scmp.eq.s32.totalorder %s829_s0, 7  ;;  %s1036_s12 = smov [#allocation5]  }
 0x1f4   : > { %s701_s13 = sshll.u32 %s1036_s12, 4  ;;  %s702_s13 = int_to_ptr.vmem [resolvable:$true] %s701_s13 }
 0x1f5   : > { %s980_s14 = scalar_lea.vmem %s702_s13, 256  ;;  %p987_p3 = scmp.lt.s32.totalorder %s702_s13, %s702_s13 }
 0x1f6   : > { %p981_p0 = scmp.ne.s32.totalorder %s702_s13, %s980_s14  ;;  %p988_p4 = scmp.lt.s32.totalorder %s980_s14, %s980_s14 }
 0x1f8   : > { %p982_p1 = pnand %p981_p0, %p1158_p13  ;;  %p989_p5 = por %p988_p4, %p987_p3 }
 0x1fa   : > { %p983_p2 = pneg %p982_p1 }
 0x1fc   : > { %p990_p6 = pnand %p989_p5, %p983_p2 }
 0x1fe   : > { %993 = shalt.err (!%p990_p6)
}
 0x1ff   : > { %s1037_s26 = smov 128   ;;  %s1038_s0 = smov 8  }
 0x200   : > { %926 = dma.vmem_to_hbm [thread:$0]  (%p1158_p13), %s702_s13, 256, %s1188_s6, [#allocation6], %s1037_s26, %s1037_s26, %s1038_s0  }
 0x201   : > { %1019 = dma.done.wait (%p1158_p13), [#allocation6], 256  }
 0x202   : > { %1021 = vsyncadd (%p1158_p13), [#allocation6], 4294967040 }
 0x203 PF: > { %s23_s28 = sadd.s32 1, %s1032_s28   ;;  %s1190_s26 = smov %s1028_s27 }
 0x204   : > { %p20_p7 = scmp.ge.s32.totalorder %s23_s28, 10   ;;  %s1191_s27 = smov %s1193_s29 }
 0x206   :  { %22 = sbr.rel (!%p20_p7) target bundleno = 17 (0x11), region = 92 }
 0x20b   :  { %717 = vsyncpa [#allocation6], 1 }
 0x20c   :  { %719 = vsyncpa [#allocation6 + $0x1], 1 }

</bundles_post_ra>
